<compile_context>
chip_gen: v5e
topology: v5e:2x2
jax: 0.10.0
libtpu: 0.0.40
codegen_flags: <defaults>
</compile_context>

<pallas_src>
import jax
import jax.numpy as jnp
from jax.experimental import pallas as pl
from jax.experimental.pallas import tpu as pltpu

EPS = 1e-5           # BatchNorm2d default eps
_ROLL_SIGN = 1       # set by _detect_roll_sign() before any kernel is traced


# ------------------------------ small helpers -------------------------------
def hardswish(x):
    return x * jnp.clip(x + 3.0, 0.0, 6.0) * (1.0 / 6.0)


def hswish6(x):
    # 6 * hardswish(x); the 1/6 is folded into the following linear weights.
    return x * jnp.clip(x + 3.0, 0.0, 6.0)


def _detect_roll_sign():
    """One-time eager probe for pltpu.roll's shift direction."""
    x = jnp.arange(8 * 128, dtype=jnp.float32).reshape(8, 128)

    def k(x_ref, o_ref):
        o_ref[...] = pltpu.roll(x_ref[...], 1, axis=1)

    y = pl.pallas_call(k, out_shape=jax.ShapeDtypeStruct((8, 128), jnp.float32))(x)
    if bool(jnp.allclose(y, jnp.roll(x, 1, axis=1))):
        return 1
    if bool(jnp.allclose(y, jnp.roll(x, -1, axis=1))):
        return -1
    raise AssertionError("unexpected pltpu.roll semantics")


def _flat_roll(v, off, HW):
    """result[i] = v[(i + off) % HW] along the flat (lane) axis."""
    if off % HW == 0:
        return v
    shift = (_ROLL_SIGN * (-off)) % HW
    return pltpu.roll(v, shift, axis=1)


def _shift_zero(v, dm, dk, H, W, row, col):
    """v[m+dm, k+dk] on the flat (C, H*W) layout, zero outside the HxW grid."""
    HW = H * W
    r = _flat_roll(v, dm * W + dk, HW)
    mask = None
    if dm == -1:
        mask = row > 0
    elif dm == 1:
        mask = row < (H - 1)
    if dk == -1:
        m2 = col > 0
        mask = m2 if mask is None else jnp.logical_and(mask, m2)
    elif dk == 1:
        m2 = col < (W - 1)
        mask = m2 if mask is None else jnp.logical_and(mask, m2)
    if mask is None:
        return r
    return jnp.where(mask, r, 0.0)


def _shift_clamp_rows(v, dm, H, W, row):
    r = _flat_roll(v, dm * W, H * W)
    mask = (row > 0) if dm == -1 else (row < (H - 1))
    return jnp.where(mask, r, v)


def _shift_clamp_cols(v, dk, H, W, col):
    r = _flat_roll(v, dk, H * W)
    mask = (col > 0) if dk == -1 else (col < (W - 1))
    return jnp.where(mask, r, v)


def _conv1x1(w, y):
    """(Cout, Cin) @ (Cin, HW), unrolled VPU FMAs (Cin <= 16, Cout <= 8)."""
    acc = w[:, 0:1] * y[0:1, :]
    for c in range(1, y.shape[0]):
        acc = acc + w[:, c:c + 1] * y[c:c + 1, :]
    return acc


def _upsample_phase(a, b, x, xw, xh, xhw, tw):
    """Phase (a, b) of depthwise ConvTranspose2d(3, stride=2, pad=1, out_pad=1)."""
    def t(i, j):
        k = 3 * i + j
        return tw[:, k:k + 1]
    if (a, b) == (0, 0):
        return t(1, 1) * x
    if (a, b) == (0, 1):
        return t(1, 0) * xw + t(1, 2) * x
    if (a, b) == (1, 0):
        return t(0, 1) * xh + t(2, 1) * x
    return t(0, 0) * xhw + t(0, 2) * xh + t(2, 0) * xw + t(2, 2) * x


def _phase_src(a, d):
    """Full-res offset d on output phase a -> (source phase, half-res shift)."""
    if d == 0:
        return a, 0
    if d == 1:
        return (1, 0) if a == 0 else (0, 1)
    return (1, -1) if a == 0 else (0, 0)


# --------------------------------- kernels -----------------------------------
def make_upsample_cna_kernel(Cs, H, W):
    """UpSample(sum Cs) + ConvNormActive(sum Cs, Cout, 1); groups avoid concat."""
    G = len(Cs)

    def kernel(*refs):
        it = iter(refs)
        xs = [next(it) for _ in range(G)]
        row = next(it)[...]
        col = next(it)[...]
        tws, tbs, w1s = [], [], []
        for _ in range(G):
            tws.append(next(it)[...])
            tbs.append(next(it)[...])
            w1s.append(next(it)[...])
        b1 = next(it)[...]
        o_ref = next(it)

        planes = []
        for g in range(G):
            x = xs[g][0]
            planes.append((x,
                           _shift_zero(x, 0, 1, H, W, row, col),
                           _shift_zero(x, 1, 0, H, W, row, col),
                           _shift_zero(x, 1, 1, H, W, row, col)))

        for a in (0, 1):
            for b in (0, 1):
                acc = None
                for g in range(G):
                    y = hswish6(_upsample_phase(a, b, *planes[g], tws[g]) + tbs[g])
                    c = _conv1x1(w1s[g], y)
                    acc = c if acc is None else acc + c
                o_ref[0, 2 * a + b] = hardswish(acc + b1).astype(o_ref.dtype)

    return kernel


def make_predict_kernel(Cs, H, W, has_pt):
    """Fused predicts[t]: UpSample + 1x1 CNA + polyphase depthwise 3x3 CNA +
    1x1 CNA (+ bilinear-x2 residual of pt), all at half resolution."""
    G = len(Cs)

    def kernel(*refs):
        it = iter(refs)
        xs = [next(it) for _ in range(G)]
        row = next(it)[...]
        col = next(it)[...]
        tws, tbs, w1s = [], [], []
        for _ in range(G):
            tws.append(next(it)[...])
            tbs.append(next(it)[...])
            w1s.append(next(it)[...])
        b1 = next(it)[...]
        dwt = next(it)[...]
        dwb = next(it)[...]
        w2 = next(it)[...]
        bias2 = next(it)[...]
        o_ref = next(it)

        planes = []
        for g in range(G):
            x = xs[g][0]
            planes.append((x,
                           _shift_zero(x, 0, 1, H, W, row, col),
                           _shift_zero(x, 1, 0, H, W, row, col),
                           _shift_zero(x, 1, 1, H, W, row, col)))

        # UpSample + first 1x1 CNA, kept as 4 polyphase planes of (Cmid, HW).
        h = [[None, None], [None, None]]
        for a in (0, 1):
            for b in (0, 1):
                acc = None
                for g in range(G):
                    y = hswish6(_upsample_phase(a, b, *planes[g], tws[g]) + tbs[g])
                    c = _conv1x1(w1s[g], y)
                    acc = c if acc is None else acc + c
                h[a][b] = hswish6(acc + b1)

        # Row-interpolated halves of the bilinear-x2 residual of pt.
        if has_pt:
            p = xs[G - 1][0]
            r_rows = (0.25 * _shift_clamp_rows(p, -1, H, W, row) + 0.75 * p,
                      0.75 * p + 0.25 * _shift_clamp_rows(p, 1, H, W, row))

        def dtap(i, j):
            k = 3 * i + j
            return dwt[:, k:k + 1]

        # Polyphase depthwise 3x3 + second 1x1 CNA (+ residual), per phase.
        for a in (0, 1):
            for b in (0, 1):
                acc = None
                for dy in (-1, 0, 1):
                    sa, dm = _phase_src(a, dy)
                    for dx in (-1, 0, 1):
                        sb, dk = _phase_src(b, dx)
                        v = h[sa][sb]
                        if dm != 0 or dk != 0:
                            v = _shift_zero(v, dm, dk, H, W, row, col)
                        term = dtap(dy + 1, dx + 1) * v
                        acc = term if acc is None else acc + term
                d = hswish6(acc + dwb)
                z = hardswish(_conv1x1(w2, d) + bias2)
                if has_pt:
                    ra = r_rows[a]
                    if b == 0:
                        z = z + (0.25 * _shift_clamp_cols(ra, -1, H, W, col)
                                 + 0.75 * ra)
                    else:
                        z = z + (0.75 * ra
                                 + 0.25 * _shift_clamp_cols(ra, 1, H, W, col))
                o_ref[0, 2 * a + b] = z.astype(o_ref.dtype)

    return kernel


# --------------------------- pallas_call wrappers ----------------------------
def _const_spec(shape):
    zeros = (0,) * len(shape)
    return pl.BlockSpec(shape, lambda n, _z=zeros: _z)


def _batch_spec(C, HW):
    return pl.BlockSpec((1, C, HW), lambda n: (n, 0, 0))


def _row_col(H, W):
    i = jnp.arange(H * W, dtype=jnp.int32)
    rowf = (i // W).astype(jnp.float32).reshape(1, H * W)
    colf = (i % W).astype(jnp.float32).reshape(1, H * W)
    return rowf, colf


def _interleave_phases(phases, C, H, W):
    # phases: (N, 4, C, H*W), phase index = 2*a + b  ->  (N, C, 2H, 2W).
    N = phases.shape[0]
    t = phases.reshape(N, 2, 2, C, H, W)
    t = jnp.transpose(t, (0, 3, 4, 1, 5, 2))
    return t.reshape(N, C, 2 * H, 2 * W)


def _group_args(xs, tw, tb, w1, N, HW):
    args, specs = [], []
    Cs = [x.shape[1] for x in xs]
    for x, c in zip(xs, Cs):
        args.append(x.reshape(N, c, HW))
        specs.append(_batch_spec(c, HW))
    wargs, wspecs = [], []
    off = 0
    for c in Cs:
        for wa in (tw[off:off + c], tb[off:off + c], w1[:, off:off + c]):
            wargs.append(wa)
            wspecs.append(_const_spec(wa.shape))
        off += c
    return Cs, args, specs, wargs, wspecs


def upsample_cna_block(xs, params):
    """UpSample + ConvNormActive(.., Cout, 1) on the channel-concat of xs."""
    tw, tb, w1, b1 = params
    N, _, H, W = xs[0].shape
    HW = H * W
    Cout = w1.shape[0]
    rowf, colf = _row_col(H, W)

    Cs, args, specs, wargs, wspecs = _group_args(xs, tw, tb, w1, N, HW)
    args = args + [rowf, colf] + wargs + [b1]
    specs = specs + [_const_spec(rowf.shape), _const_spec(colf.shape)] + wspecs \
        + [_const_spec(b1.shape)]

    phases = pl.pallas_call(
        make_upsample_cna_kernel(Cs, H, W),
        grid=(N,),
        in_specs=specs,
        out_specs=pl.BlockSpec((1, 4, Cout, HW), lambda n: (n, 0, 0, 0)),
        out_shape=jax.ShapeDtypeStruct((N, 4, Cout, HW), jnp.float32),
        compiler_params=pltpu.CompilerParams(dimension_semantics=("parallel",)),
    )(*args)
    return _interleave_phases(phases, Cout, H, W)


def predict_block(x_groups, pt, params):
    """predicts[t] fused; pt (or None at t==0) is both the last channel group
    of the UpSample input and the bilinear residual source."""
    tw, tb, w1, b1 = params['up_cna']
    dwt, dwb = params['dw']
    w2, b2 = params['cna2']
    xs = list(x_groups) + ([pt] if pt is not None else [])
    N, _, H, W = xs[0].shape
    HW = H * W
    Cout = w2.shape[0]
    rowf, colf = _row_col(H, W)

    Cs, args, specs, wargs, wspecs = _group_args(xs, tw, tb, w1, N, HW)
    tail = [b1, dwt, dwb, w2, b2]
    args = args + [rowf, colf] + wargs + tail
    specs = specs + [_const_spec(rowf.shape), _const_spec(colf.shape)] + wspecs \
        + [_const_spec(a.shape) for a in tail]

    phases = pl.pallas_call(
        make_predict_kernel(Cs, H, W, pt is not None),
        grid=(N,),
        in_specs=specs,
        out_specs=pl.BlockSpec((1, 4, Cout, HW), lambda n: (n, 0, 0, 0)),
        out_shape=jax.ShapeDtypeStruct((N, 4, Cout, HW), jnp.float32),
        compiler_params=pltpu.CompilerParams(dimension_semantics=("parallel",)),
    )(*args)
    return _interleave_phases(phases, Cout, H, W)


# -------------------------------- parameters ---------------------------------
class _KeyGen:
    def __init__(self, key):
        self._key = key

    def __call__(self):
        self._key, sub = jax.random.split(self._key)
        return sub


def _make_bn(kg, c):
    return dict(gamma=1.0 + 0.1 * jax.random.normal(kg(), (c,), jnp.float32),
                beta=0.1 * jax.random.normal(kg(), (c,), jnp.float32),
                mean=0.1 * jax.random.normal(kg(), (c,), jnp.float32),
                var=1.0 + 0.1 * jnp.abs(jax.random.normal(kg(), (c,), jnp.float32)))


def _make_up(kg, c):
    # ConvTranspose2d(c, c, 3, 2, 1, output_padding=1, groups=c, bias=False) + BN
    return dict(w=0.3 * jax.random.normal(kg(), (c, 3, 3), jnp.float32), **_make_bn(kg, c))


def _make_cna1x1(kg, cin, cout):
    return dict(w=0.3 * jax.random.normal(kg(), (cout, cin), jnp.float32),
                b=0.1 * jax.random.normal(kg(), (cout,), jnp.float32), **_make_bn(kg, cout))


def _make_dw(kg, c):
    return dict(w=0.3 * jax.random.normal(kg(), (c, 3, 3), jnp.float32),
                b=0.1 * jax.random.normal(kg(), (c,), jnp.float32), **_make_bn(kg, c))


def init_segpredictor(key, in_planes, num_classes, num_scans):
    """Mirrors SegPredictor.__init__ (self.decoder is never used in forward)."""
    kg = _KeyGen(key)
    emb = int((num_classes + 2) ** 0.5)
    upsamples = {}
    predicts = []
    for t in range(num_scans):
        hidden = in_planes
        out = max(hidden // 2, emb)
        if t > 0:
            upsamples[f'{t}'] = dict(up=_make_up(kg, hidden),
                                     cna=_make_cna1x1(kg, hidden, out))
            hidden = out + emb
            out = max(out // 2, emb)
        for k in range(t - 1):
            upsamples[f'{t}_{k}'] = dict(up=_make_up(kg, hidden),
                                         cna=_make_cna1x1(kg, hidden, out))
            hidden = out + emb
            out = max(out // 2, emb)
        predicts.append(dict(up=_make_up(kg, hidden),
                             cna1=_make_cna1x1(kg, hidden, out),
                             dw=_make_dw(kg, out),
                             cna2=_make_cna1x1(kg, out, emb)))
    return dict(upsamples=upsamples, predicts=predicts, emb=emb)


def _bn_scale_shift(p):
    s = p['gamma'] / jnp.sqrt(p['var'] + EPS)
    return s, p['beta'] - s * p['mean']


def fold_up_cna(up, cna):
    # UpSample (ConvT + BN + hswish) followed by 1x1 Conv + BN; 1/6 folded into w1.
    s1, t1 = _bn_scale_shift(up)
    c = up['w'].shape[0]
    tw = (up['w'] * s1[:, None, None]).reshape(c, 9)
    tb = t1[:, None]
    s2, t2 = _bn_scale_shift(cna)
    w1 = cna['w'] * s2[:, None] * (1.0 / 6.0)
    b1 = (s2 * cna['b'] + t2)[:, None]
    return tw, tb, w1, b1


def fold_dw(p):
    # depthwise 3x3 Conv + BN; the preceding hswish's 1/6 folded into the taps.
    s, t = _bn_scale_shift(p)
    c = p['w'].shape[0]
    return ((p['w'] * s[:, None, None] * (1.0 / 6.0)).reshape(c, 9),
            (s * p['b'] + t)[:, None])


def fold_cna1x1(p):
    # 1x1 Conv + BN; the preceding hswish's 1/6 folded into the weight.
    s, t = _bn_scale_shift(p)
    return p['w'] * s[:, None] * (1.0 / 6.0), (s * p['b'] + t)[:, None]


def fold_params(params):
    folded = dict(upsamples={}, predicts=[])
    for name, blk in params['upsamples'].items():
        folded['upsamples'][name] = fold_up_cna(blk['up'], blk['cna'])
    for blk in params['predicts']:
        folded['predicts'].append(dict(
            up_cna=fold_up_cna(blk['up'], blk['cna1']),
            dw=fold_dw(blk['dw']),
            cna2=fold_cna1x1(blk['cna2'])))
    return folded


# --------------------------- Pallas-backed forward ---------------------------
def segpredictor_pallas(hs, folded):
    preds = folded['predicts']
    pt = predict_block([hs[0]], None, preds[0])
    ps = [pt]
    for t in range(1, len(hs)):
        u = upsample_cna_block([hs[t]], folded['upsamples'][f'{t}'])
        for k in range(t - 1):
            u = upsample_cna_block([u, ps[k]], folded['upsamples'][f'{t}_{k}'])
        pt = predict_block([u], pt, preds[t])
        ps.append(pt)
    return ps


# ----------------------------- pure-JAX reference ----------------------------
def _ref_bn(x, gamma, beta, mean, var):
    s = gamma / jnp.sqrt(var + EPS)
    return x * s[None, :, None, None] + (beta - s * mean)[None, :, None, None]


def ref_upsample(x, w, gamma, beta, mean, var):
    N, C, H, W = x.shape
    out = jnp.zeros((N, C, 2 * H, 2 * W), x.dtype)
    for ky in range(3):
        for kx in range(3):
            iy0 = 1 if ky == 0 else 0
            ix0 = 1 if kx == 0 else 0
            oy0 = 2 * iy0 + ky - 1
            ox0 = 2 * ix0 + kx - 1
            ny = H - iy0
            nx = W - ix0
            out = out.at[:, :, oy0:oy0 + 2 * ny:2, ox0:ox0 + 2 * nx:2].add(
                x[:, :, iy0:, ix0:] * w[:, ky, kx][None, :, None, None])
    return hardswish(_ref_bn(out, gamma, beta, mean, var))


def ref_cna1x1(x, w, b, gamma, beta, mean, var):
    y = jnp.einsum('nchw,oc->nohw', x, w,
                   precision=jax.lax.Precision.HIGHEST) + b[None, :, None, None]
    return hardswish(_ref_bn(y, gamma, beta, mean, var))


def ref_cna_dw3x3(x, w, b, gamma, beta, mean, var):
    N, C, H, W = x.shape
    xp = jnp.pad(x, ((0, 0), (0, 0), (1, 1), (1, 1)))
    acc = jnp.zeros_like(x)
    for ky in range(3):
        for kx in range(3):
            acc = acc + xp[:, :, ky:ky + H, kx:kx + W] * w[:, ky, kx][None, :, None, None]
    y = acc + b[None, :, None, None]
    return hardswish(_ref_bn(y, gamma, beta, mean, var))


def ref_bilinear2x(x):
    N, C, H, W = x.shape

    def interp(arr, size, axis):
        out_idx = jnp.arange(2 * size)
        src = (out_idx + 0.5) / 2.0 - 0.5
        src = jnp.maximum(src, 0.0)
        i0 = jnp.floor(src).astype(jnp.int32)
        i1 = jnp.minimum(i0 + 1, size - 1)
        lam = src - i0.astype(src.dtype)
        a0 = jnp.take(arr, i0, axis=axis)
        a1 = jnp.take(arr, i1, axis=axis)
        shape = [1] * arr.ndim
        shape[axis] = 2 * size
        lam = lam.reshape(shape)
        return a0 * (1.0 - lam) + a1 * lam

    y = interp(x, H, 2)
    return interp(y, W, 3)


def ref_up_cna_block(x, up, cna):
    return ref_cna1x1(ref_upsample(x, **up), **cna)


def segpredictor_ref(hs, params):
    preds = params['predicts']
    p0 = preds[0]
    y = ref_up_cna_block(hs[0], p0['up'], p0['cna1'])
    y = ref_cna_dw3x3(y, **p0['dw'])
    pt = ref_cna1x1(y, **p0['cna2'])
    ps = [pt]
    for t in range(1, len(hs)):
        ub = params['upsamples'][f'{t}']
        u = ref_up_cna_block(hs[t], ub['up'], ub['cna'])
        for k in range(t - 1):
            ub = params['upsamples'][f'{t}_{k}']
            u = ref_up_cna_block(jnp.concatenate([u, ps[k]], axis=1), ub['up'], ub['cna'])
        pb = preds[t]
        y = ref_up_cna_block(jnp.concatenate([u, pt], axis=1), pb['up'], pb['cna1'])
        y = ref_cna_dw3x3(y, **pb['dw'])
        y = ref_cna1x1(y, **pb['cna2'])
        pt = y + ref_bilinear2x(pt)
        ps.append(pt)
    return ps


if __name__ == "__main__":
    _ROLL_SIGN = _detect_roll_sign()   # pin down pltpu.roll direction (eager, once)

    N, in_planes, H, W = 2, 16, 16, 16
    num_classes, num_scans = 14, 2      # embeded_dim = int(sqrt(16)) = 4

    key = jax.random.PRNGKey(0)
    kh, kp = jax.random.split(key)
    hkeys = jax.random.split(kh, num_scans)
    hs = [jax.random.normal(hkeys[t], (N, in_planes, H, W), jnp.float32)
          for t in range(num_scans)]

    params = init_segpredictor(kp, in_planes, num_classes, num_scans)
    folded = fold_params(params)

    outs = jax.jit(segpredictor_pallas)(hs, folded)
    outs = jax.block_until_ready(outs)

    refs = segpredictor_ref(hs, params)
    emb = params['emb']
    assert len(outs) == num_scans
    for t, (o, r) in enumerate(zip(outs, refs)):
        expect = (N, emb, H * 2 ** (t + 1), W * 2 ** (t + 1))
        assert o.shape == r.shape == expect, (o.shape, r.shape, expect)
        err = float(jnp.max(jnp.abs(o - r)))
        assert jnp.allclose(o, r, atol=2e-4, rtol=2e-4), err
    print("KERNEL_OK")
</pallas_src>

<mosaic_0001>
module attributes {stable_mosaic.version = 11 : i64} {
  func.func @k(%arg0: memref<8x128xf32, #tpu.memory_space<vmem>>, %arg1: memref<8x128xf32, #tpu.memory_space<vmem>>) attributes {dimension_semantics = [], scalar_prefetch = 0 : i64, scratch_operands = 0 : i64, tpu.core_type = #tpu.core_type<tc>} {
    %c0 = arith.constant 0 : index
    %c0_0 = arith.constant 0 : index
    %0 = vector.load %arg0[%c0, %c0_0] : memref<8x128xf32, #tpu.memory_space<vmem>>, vector<8x128xf32>
    %c1_i32 = arith.constant 1 : i32
    %1 = tpu.dynamic_rotate %0 by %c1_i32 dim 1 : vector<8x128xf32>, i32 -> vector<8x128xf32>
    %c0_1 = arith.constant 0 : index
    %c0_2 = arith.constant 0 : index
    %2 = vector.load %arg1[%c0_1, %c0_2] : memref<8x128xf32, #tpu.memory_space<vmem>>, vector<8x128xf32>
    tpu.vector_store %arg1[%c0_1, %c0_2], %1 {strides = array<i32>} : memref<8x128xf32, #tpu.memory_space<vmem>>, vector<8x128xf32>,
    return
  }
}

</mosaic_0001>

<bundles_post_ra>
// kernel: tpu_custom_call.1
= control target key start
LH: loop header
LB: loop body
LE: loop exit
PB: predicated region body
PF: predicated region fallthrough
CT: control target
= control target key end

     0   :  { %6 = vsyncpa [#allocation3], 0  ;;  %s118_s0 = inlined_call_operand.hbm [shape: f32[8,128], index: 0, kind: input, shape index: {}]   ;;  %s119_s1 = inlined_call_operand.hbm [shape: f32[8,128], index: 1, kind: output, shape index: {}]  }
   0x1   :  { %7 = vsyncpa [#allocation4], 0  ;;  %s13_s8 = sshll.u32 %s118_s0, 4  ;;  %s99_s9 = smov [#allocation2]   ;;  %s14_s8 = int_to_ptr.hbm [resolvable:$true] %s13_s8 }
   0x2   :  { %s15_s10 = sshll.u32 %s99_s9, 4  ;;  %s16_s10 = int_to_ptr.vmem [resolvable:$true] %s15_s10 }
   0x3   :  { %18 = dma.hbm_to_vmem [thread:$0]  %s14_s8, 128, %s16_s10, [#allocation3]  }
   0x4   :  { %95 = dma.done.wait [#allocation3], 128  }
   0x5   :  { %96 = vsyncadd [#allocation3], 4294967168  ;;  %v23_v0 = vld [vmem:[#allocation2] sm:$0xff]  ;;  %s100_s11 = smov 1   ;;  %s101_s12 = smov [#allocation5]  }
   0x6   :  { %24 = vrot.lane.b32.xlu0 %v23_v0, %s100_s11  ;;  %s32_s13 = sshll.u32 %s101_s12, 4  ;;  %s34_s16 = sshll.u32 %s119_s1, 4  ;;  %s33_s13 = int_to_ptr.vmem [resolvable:$true] %s32_s13  ;;  %s35_s16 = int_to_ptr.hbm [resolvable:$true] %s34_s16 }
  0x78   :  { %v25_v1 = vpop.permute.xlu0 %24 }
  0x79   :  { %26 = vst [vmem:[#allocation5] sm:$0xff] %v25_v1 }
  0x7a   :  { %37 = dma.vmem_to_hbm [thread:$0]  %s33_s13, 128, %s35_s16, [#allocation4]  }
  0x7b   :  { %97 = dma.done.wait [#allocation4], 128  }
  0x7c   :  { %98 = vsyncadd [#allocation4], 4294967168 }
  0x7d   :  { %42 = vsyncpa [#allocation3], 1 }
  0x7e   :  { %43 = vsyncpa [#allocation4], 1 }

</bundles_post_ra>
